<compile_context>
chip_gen: v7x
topology: tpu7x:2x2x1
jax: 0.10.0
libtpu: 0.0.40
codegen_flags: <defaults>
</compile_context>

<pallas_src>
import jax
import jax.numpy as jnp
from jax.experimental import pallas as pl
from jax.experimental.pallas import tpu as pltpu

N_IN = 784
N_OUT = 10
N_PAD = 128  # lane-dense class dimension


def linear_softmax_kernel(x_ref, w_ref, b_ref, o_ref):
    # x_ref: (TB, 784) bf16, w_ref: (784, 128) bf16, b_ref: (1, 128) f32
    x = x_ref[...]
    w = w_ref[...]
    b = b_ref[...]
    # MXU matmul, f32 accumulation; bias add in f32.
    logits = jnp.dot(x, w, preferred_element_type=jnp.float32) + b  # (TB, 128)
    # Numerically-stable softmax over the 128 (padded) lanes; padded lanes have
    # bias -1e30 so exp() there is exactly 0 and they absorb no probability.
    m = jnp.max(logits, axis=-1, keepdims=True)
    e = jnp.exp(logits - m)
    s = jnp.sum(e, axis=-1, keepdims=True)
    o_ref[...] = (e * pl.reciprocal(s, approx=True)).astype(o_ref.dtype)


def prepare_params(weight, bias):
    """Hoist the transpose / class-dim padding out of the forward path.

    weight: (10, 784) as in torch.nn.Linear; bias: (10,).
    Returns (784, 128) bf16 weight and (1, 128) f32 bias with -1e30 padding.
    """
    wt = jnp.zeros((N_IN, N_PAD), dtype=jnp.bfloat16)
    wt = wt.at[:, :N_OUT].set(weight.T.astype(jnp.bfloat16))
    bp = jnp.full((1, N_PAD), -1e30, dtype=jnp.float32)
    bp = bp.at[:, :N_OUT].set(bias.astype(jnp.float32))
    return wt, bp


def mnist_forward(x, wt_padded, b_padded, *, tb=512):
    """x: any shape with 784 trailing elements per sample (e.g. (B, 1, 28, 28))."""
    x2d = x.reshape(-1, N_IN).astype(jnp.bfloat16)  # bf16 streaming of activations
    B = x2d.shape[0]

    # Tile size: multiple of 8 (f32/bf16 sublane-friendly), no bigger than needed.
    TB = min(tb, ((B + 7) // 8) * 8)
    Bp = ((B + TB - 1) // TB) * TB
    if Bp != B:
        x2d = jnp.pad(x2d, ((0, Bp - B), (0, 0)))

    grid = (Bp // TB,)

    out = pl.pallas_call(
        linear_softmax_kernel,
        out_shape=jax.ShapeDtypeStruct((Bp, N_PAD), jnp.float32),
        grid=grid,
        in_specs=[
            pl.BlockSpec((TB, N_IN), lambda i: (i, 0)),      # batch-tiled x
            pl.BlockSpec((N_IN, N_PAD), lambda i: (0, 0)),   # weight, resident
            pl.BlockSpec((1, N_PAD), lambda i: (0, 0)),      # bias, resident
        ],
        out_specs=pl.BlockSpec((TB, N_PAD), lambda i: (i, 0)),
        compiler_params=pltpu.CompilerParams(
            dimension_semantics=("parallel",),
        ),
    )(x2d, wt_padded, b_padded)

    return out[:B, :N_OUT]


def reference_forward(x, weight, bias):
    x2d = x.reshape(-1, N_IN).astype(jnp.float32)
    logits = x2d @ weight.T.astype(jnp.float32) + bias.astype(jnp.float32)
    return jax.nn.softmax(logits, axis=-1)


if __name__ == "__main__":
    key = jax.random.PRNGKey(0)
    kx, kw, kb = jax.random.split(key, 3)

    # torch.nn.Linear(784, 10) parameter shapes
    weight = jax.random.normal(kw, (10, 784), dtype=jnp.float32) * 0.02
    bias = jax.random.normal(kb, (10,), dtype=jnp.float32) * 0.01

    # small MNIST-like batch: (B, 1, 28, 28)
    x = jax.random.normal(kx, (8, 1, 28, 28), dtype=jnp.float32)

    wt_padded, b_padded = prepare_params(weight, bias)

    out = mnist_forward(x, wt_padded, b_padded)
    out = jax.block_until_ready(out)

    ref = reference_forward(x, weight, bias)

    assert out.shape == (8, 10)
    # rows sum to 1 (approx reciprocal + bf16 streaming -> loose tolerance)
    assert jnp.allclose(jnp.sum(out, axis=1), 1.0, atol=1e-2)
    # matches f32 reference up to bf16 streaming precision
    assert jnp.allclose(out, ref, atol=2e-2)

    print("KERNEL_OK")
</pallas_src>

<mosaic_0001>
module attributes {stable_mosaic.version = 11 : i64} {
  func.func @linear_softmax_kernel(%arg0: i32, %arg1: memref<8x784xbf16, #tpu.memory_space<vmem>>, %arg2: memref<784x128xbf16, #tpu.memory_space<vmem>>, %arg3: memref<1x128xf32, #tpu.memory_space<vmem>>, %arg4: memref<8x128xf32, #tpu.memory_space<vmem>>) attributes {dimension_semantics = [#tpu.dimension_semantics<parallel>], iteration_bounds = array<i64: 1>, scalar_prefetch = 0 : i64, scratch_operands = 0 : i64, tpu.core_type = #tpu.core_type<tc>, window_params = [{transform_indices = @transform_0, window_bounds = array<i64: 8, 784>}, {pipeline_mode = #tpu.pipeline_mode<synchronous>, transform_indices = @transform_1, window_bounds = array<i64: 784, 128>}, {pipeline_mode = #tpu.pipeline_mode<synchronous>, transform_indices = @transform_2, window_bounds = array<i64: 1, 128>}, {transform_indices = @transform_3, window_bounds = array<i64: 8, 128>}]} {
    %c0 = arith.constant 0 : index
    %c0_0 = arith.constant 0 : index
    %0 = vector.load %arg1[%c0, %c0_0] : memref<8x784xbf16, #tpu.memory_space<vmem>>, vector<8x784xbf16>
    %c0_1 = arith.constant 0 : index
    %c0_2 = arith.constant 0 : index
    %1 = vector.load %arg2[%c0_1, %c0_2] : memref<784x128xbf16, #tpu.memory_space<vmem>>, vector<784x128xbf16>
    %c0_3 = arith.constant 0 : index
    %c0_4 = arith.constant 0 : index
    %2 = vector.load %arg3[%c0_3, %c0_4] : memref<1x128xf32, #tpu.memory_space<vmem>>, vector<1x128xf32>
    %cst = arith.constant dense<0.000000e+00> : vector<8x128xf32>
    %3 = tpu.matmul %0, %1, %cst {dimension_numbers = #tpu.dot_dimension_numbers<[1], [0], [0], [1], [0, 0, 1, 1], [], []>} : vector<8x784xbf16>, vector<784x128xbf16>, vector<8x128xf32> -> vector<8x128xf32>
    %4 = vector.broadcast %2 : vector<1x128xf32> to vector<8x128xf32>
    %5 = arith.addf %3, %4 : vector<8x128xf32>
    %cst_5 = arith.constant dense<0xFF800000> : vector<8xf32>
    %6 = vector.multi_reduction <maximumf>, %5, %cst_5 [1] : vector<8x128xf32> to vector<8xf32>
    %7 = vector.shape_cast %6 : vector<8xf32> to vector<8x1xf32>
    %8 = vector.broadcast %7 : vector<8x1xf32> to vector<8x128xf32>
    %9 = arith.subf %5, %8 : vector<8x128xf32>
    %10 = math.exp %9 : vector<8x128xf32>
    %cst_6 = arith.constant dense<0.000000e+00> : vector<8xf32>
    %11 = vector.multi_reduction <add>, %10, %cst_6 [1] : vector<8x128xf32> to vector<8xf32>
    %12 = vector.shape_cast %11 : vector<8xf32> to vector<8x1xf32>
    %13 = tpu.reciprocal %12 {approx = true} : vector<8x1xf32> -> vector<8x1xf32>
    %14 = vector.broadcast %13 : vector<8x1xf32> to vector<8x128xf32>
    %15 = arith.mulf %10, %14 : vector<8x128xf32>
    %c0_7 = arith.constant 0 : index
    %c0_8 = arith.constant 0 : index
    %16 = vector.load %arg4[%c0_7, %c0_8] : memref<8x128xf32, #tpu.memory_space<vmem>>, vector<8x128xf32>
    tpu.vector_store %arg4[%c0_7, %c0_8], %15 {strides = array<i32>} : memref<8x128xf32, #tpu.memory_space<vmem>>, vector<8x128xf32>,
    return
  }
  func.func @transform_0(%arg0: i32) -> (i32, i32) {
    %c0_i32 = arith.constant 0 : i32
    %c0_i32_0 = arith.constant 0 : i32
    return %arg0, %c0_i32 : i32, i32
  }
  func.func @transform_1(%arg0: i32) -> (i32, i32) {
    %c0_i32 = arith.constant 0 : i32
    %c0_i32_0 = arith.constant 0 : i32
    %c0_i32_1 = arith.constant 0 : i32
    return %c0_i32, %c0_i32_0 : i32, i32
  }
  func.func @transform_2(%arg0: i32) -> (i32, i32) {
    %c0_i32 = arith.constant 0 : i32
    %c0_i32_0 = arith.constant 0 : i32
    %c0_i32_1 = arith.constant 0 : i32
    return %c0_i32, %c0_i32_0 : i32, i32
  }
  func.func @transform_3(%arg0: i32) -> (i32, i32) {
    %c0_i32 = arith.constant 0 : i32
    %c0_i32_0 = arith.constant 0 : i32
    return %arg0, %c0_i32 : i32, i32
  }
}

</mosaic_0001>

<bundles_post_ra>
// kernel: tpu_custom_call.1
= control target key start
LH: loop header
LB: loop body
LE: loop exit
PB: predicated region body
PF: predicated region fallthrough
CT: control target
= control target key end

     0   :  { %8 = vsyncpa [#allocation3], 0  ;;  %s1003_s0 = inlined_call_operand.hbm [shape: bf16[8,784], index: 0, kind: input, shape index: {}]   ;;  %s1004_s1 = inlined_call_operand.hbm [shape: bf16[784,128], index: 1, kind: input, shape index: {}]   ;;  %s1005_s2 = inlined_call_operand.vmem [shape: f32[1,128], index: 2, kind: input, shape index: {}]   ;;  %s1006_s3 = inlined_call_operand.hbm [shape: f32[8,128], index: 3, kind: output, shape index: {}]  }
   0x1   :  { %9 = vsyncpa [#allocation6], 0 }
   0x2   :  { %10 = vsyncpa [#allocation4], 0  ;;  %s930_s12 = smov [#allocation2]   ;;  %s931_s14 = smov [#allocation5]  }
   0x3   :  { %s17_s13 = sshll.u32 %s930_s12, 4  ;;  %s26_s15 = sshll.u32 %s931_s14, 4  ;;  %s18_s13 = int_to_ptr.vmem [resolvable:$true] %s17_s13  ;;  %s957_s15 = int_to_ptr.vmem [resolvable:$true] %s26_s15 }
   0x4   :  { %s858_s18 = scalar_lea.hbm %s1003_s0, 448 }
   0x5   :  { %p859_p0 = scmp.ne.s32.totalorder %s1003_s0, %s858_s18  ;;  %p862_p1 = scmp.lt.u32.totalorder %s858_s18, %s1003_s0 }
   0x7   :  { %p864_p2 = pnand %p862_p1, %p859_p0 }
   0x9   :  { %867 = shalt.err (!%p864_p2)
}
   0xa   :  { %s868_s23 = scalar_lea.vmem %s18_s13, 448  ;;  %p873_p4 = scmp.lt.s32.totalorder %s18_s13, %s18_s13 }
   0xb   :  { %p869_p3 = scmp.ne.s32.totalorder %s18_s13, %s868_s23  ;;  %p874_p5 = scmp.lt.s32.totalorder %s868_s23, %s868_s23 }
   0xd   :  { %p875_p6 = por %p874_p5, %p873_p4 }
   0xf   :  { %p876_p7 = pnand %p875_p6, %p869_p3 }
  0x11   :  { %879 = shalt.err (!%p876_p7)
}
  0x12   :  { %20 = dma.hbm_to_vmem [thread:$0]  %s1003_s0, 448, %s18_s13, [#allocation3]  }
  0x13   :  { %s880_s28 = scalar_lea.hbm %s1004_s1, 6272 }
  0x14   :  { %p881_p8 = scmp.ne.s32.totalorder %s1004_s1, %s880_s28  ;;  %p884_p9 = scmp.lt.u32.totalorder %s880_s28, %s1004_s1 }
  0x16   :  { %p886_p10 = pnand %p884_p9, %p881_p8 }
  0x18   :  { %889 = shalt.err (!%p886_p10)
}
  0x19   :  { %s890_s6 = scalar_lea.vmem %s957_s15, 6272  ;;  %p895_p12 = scmp.lt.s32.totalorder %s957_s15, %s957_s15 }
  0x1a   :  { %p891_p11 = scmp.ne.s32.totalorder %s957_s15, %s890_s6  ;;  %p896_p13 = scmp.lt.s32.totalorder %s890_s6, %s890_s6 }
  0x1c   :  { %p897_p0 = por %p896_p13, %p895_p12 }
  0x1e   :  { %p898_p1 = pnand %p897_p0, %p891_p11 }
  0x20   :  { %901 = shalt.err (!%p898_p1)
}
  0x21   :  { %s932_s0 = smov 64   ;;  %s933_s7 = smov 4  }
  0x22   :  { %32 = dma.hbm_to_vmem [thread:$0]  %s1004_s1, 6272, %s957_s15, [#allocation6], %s932_s0, %s932_s0, %s933_s7  }
  0x23   :  { %924 = dma.done.wait [#allocation3], 448  }
  0x24   :  { %925 = vsyncadd [#allocation3], 4294966848 }
  0x25   :  { %926 = dma.done.wait [#allocation6], 6272  }
  0x26   :  { %927 = vsyncadd [#allocation6], 4294961024  ;;  %v798_v0 = vld [vmem:[#allocation5 + $0x40] sm:$0xff]   ;;  %v802_v4 = vld [vmem:[#allocation5 + $0x48] sm:$0xff]   ;;  %v934_v43 = vmov 0.0   ;;  %vm935_vm0 = vmmov 0  }
  0x27   :  { %v799_v1 = vld [vmem:[#allocation5] sm:$0xff]   ;;  %717 = vmatprep.subr.bf16.mxu0 %v798_v0  ;;  %v803_v5 = vld [vmem:[#allocation5 + $0x8] sm:$0xff]   ;;  %v806_v8 = vld [vmem:[#allocation5 + $0x50] sm:$0xff]   ;;  %vm469_vm1 = vcmask 130048  }
  0x28   :  { %v800_v2 = vld [vmem:[#allocation5 + $0xc0] sm:$0xff]   ;;  %718 = vmatpush3.bf16.msra.mxu0 %v799_v1  ;;  %v804_v6 = vld [vmem:[#allocation5 + $0xc8] sm:$0xff]   ;;  %v807_v9 = vld [vmem:[#allocation5 + $0x10] sm:$0xff]  }
  0x29   :  { %v801_v3 = vld [vmem:[#allocation5 + $0x80] sm:$0xff]   ;;  %739 = vmatprep.subr.bf16.mxu1 %v800_v2  ;;  %719 = vmatprep.subr.bf16.mxu0 %v802_v4  ;;  %v805_v7 = vld [vmem:[#allocation5 + $0x88] sm:$0xff]   ;;  %v808_v10 = vld [vmem:[#allocation5 + $0xd0] sm:$0xff]  }
  0x2a   :  { %740 = vmatpush3.bf16.msra.mxu1 %v801_v3  ;;  %v809_v11 = vld [vmem:[#allocation5 + $0x90] sm:$0xff]   ;;  %v810_v12 = vld [vmem:[#allocation5 + $0x58] sm:$0xff]   ;;  %v814_v16 = vld [vmem:[#allocation5 + $0x60] sm:$0xff]  }
  0x2b   :  { %741 = vmatprep.subr.bf16.mxu1 %v804_v6  ;;  %v811_v13 = vld [vmem:[#allocation5 + $0x18] sm:$0xff]   ;;  %v815_v17 = vld [vmem:[#allocation5 + $0x20] sm:$0xff]   ;;  %v818_v20 = vld [vmem:[#allocation5 + $0x68] sm:$0xff]  }
  0x2c   :  { %720 = vmatpush3.bf16.msra.mxu0 %v803_v5  ;;  %v812_v14 = vld [vmem:[#allocation5 + $0xd8] sm:$0xff]   ;;  %v816_v18 = vld [vmem:[#allocation5 + $0xe0] sm:$0xff]   ;;  %v819_v21 = vld [vmem:[#allocation5 + $0x28] sm:$0xff]  }
  0x2d   :  { %721 = vmatprep.subr.bf16.mxu0 %v806_v8  ;;  %v813_v15 = vld [vmem:[#allocation5 + $0x98] sm:$0xff]   ;;  %v817_v19 = vld [vmem:[#allocation5 + $0xa0] sm:$0xff]   ;;  %v820_v22 = vld [vmem:[#allocation5 + $0xe8] sm:$0xff]  }
  0x2e   :  { %742 = vmatpush3.bf16.msra.mxu1 %v805_v7  ;;  %v821_v23 = vld [vmem:[#allocation5 + $0xa8] sm:$0xff]   ;;  %v822_v24 = vld [vmem:[#allocation5 + $0x70] sm:$0xff]   ;;  %v826_v28 = vld [vmem:[#allocation5 + $0x78] sm:$0xff]  }
  0x2f   :  { %743 = vmatprep.subr.bf16.mxu1 %v808_v10  ;;  %v823_v25 = vld [vmem:[#allocation5 + $0x30] sm:$0xff]   ;;  %v827_v29 = vld [vmem:[#allocation5 + $0x38] sm:$0xff]   ;;  %v42_v31 = vld [vmem:[#allocation2] sm:$0xff] }
  0x30   :  { %722 = vmatpush3.bf16.msra.mxu0 %v807_v9  ;;  %v824_v26 = vld [vmem:[#allocation5 + $0xf0] sm:$0xff]   ;;  %v828_v30 = vld [vmem:[#allocation5 + $0xf8] sm:$0xff]   ;;  %v660_v32 = vcombine.low %v42_v31, %v42_v31  ;;  %v661_v33 = vcombine.high %v42_v31, %v42_v31  ;;  %v832_v35 = vld [vmem:[#allocation5 + $0x140] sm:$0xff]  }
  0x31   :  { %723 = vmatprep.subr.bf16.mxu0 %v810_v12  ;;  %v825_v27 = vld [vmem:[#allocation5 + $0xb0] sm:$0xff]   ;;  %v831_v34 = vld [vmem:[#allocation5 + $0xb8] sm:$0xff]   ;;  %v835_v39 = vld [vmem:[#allocation5 + $0x100] sm:$0xff]  }
  0x32   :  { %744 = vmatpush3.bf16.msra.mxu1 %v809_v11  ;;  %v43_v36 = vld [vmem:[#allocation2 + $0x8] sm:$0xff]  ;;  %505 = vmatprep.mubr.bf16.mxu0 %v661_v33  ;;  %v840_v45 = vld [vmem:[#allocation5 + $0x158] sm:$0xff]   ;;  %v842_v47 = vld [vmem:[#allocation5 + $0x160] sm:$0xff]  }
  0x33   :  { %745 = vmatprep.subr.bf16.mxu1 %v812_v14  ;;  %v662_v37 = vcombine.low %v43_v36, %v43_v36  ;;  %v663_v38 = vcombine.high %v43_v36, %v43_v36  ;;  %v836_v40 = vld [vmem:[#allocation5 + $0x148] sm:$0xff]   ;;  %v838_v42 = vld [vmem:[#allocation5 + $0x150] sm:$0xff]   ;;  %v841_v46 = vld [vmem:[#allocation5 + $0x118] sm:$0xff]  }
  0x34   :  { %724 = vmatpush3.bf16.msra.mxu0 %v811_v13  ;;  %v837_v41 = vld [vmem:[#allocation5 + $0x108] sm:$0xff]   ;;  %v839_v44 = vld [vmem:[#allocation5 + $0x110] sm:$0xff]   ;;  %v843_v48 = vld [vmem:[#allocation5 + $0x120] sm:$0xff]  }
  0x35   :  { %725 = vmatprep.subr.bf16.mxu0 %v814_v16  ;;  %545 = vmatprep.mubr.bf16.mxu1 %v663_v38  ;;  %v844_v49 = vld [vmem:[#allocation5 + $0x168] sm:$0xff]   ;;  %v850_v50 = vld [vmem:[#allocation5 + $0x180] sm:$0xff]   ;;  %v44_v51 = vld [vmem:[#allocation2 + $0x10] sm:$0xff] }
  0x36   :  { %746 = vmatpush3.bf16.msra.mxu1 %v813_v15  ;;  %v665_v52 = vcombine.high %v44_v51, %v44_v51  ;;  %v853_v53 = vld [vmem:[#allocation2 + $0x18] ss:$0 sps:$4 sm:$0xff]   ;;  %v845_v54 = vld [vmem:[#allocation5 + $0x128] sm:$0xff]   ;;  %v846_v55 = vld [vmem:[#allocation5 + $0x170] sm:$0xff]   ;;  %v664_v59 = vcombine.low %v44_v51, %v44_v51 }
  0x37   :  { %747 = vmatprep.subr.bf16.mxu1 %v816_v18  ;;  %v847_v56 = vld [vmem:[#allocation5 + $0x130] sm:$0xff]   ;;  %v848_v57 = vld [vmem:[#allocation5 + $0x178] sm:$0xff]   ;;  %v659_v61 = vld [vmem:[%s1005_s2] ss:$0 sm:$0xff]  ;;  %s936_s2 = smov [#allocation7]  }
  0x38   :  { %726 = vmatpush3.bf16.msra.mxu0 %v815_v17  ;;  %v849_v58 = vld [vmem:[#allocation5 + $0x138] sm:$0xff]   ;;  %s649_s11 = sshll.u32 %s936_s2, 4  ;;  %s650_s11 = int_to_ptr.vmem [resolvable:$true] %s649_s11 }
  0x39   :  { %727 = vmatprep.subr.bf16.mxu0 %v818_v20  ;;  %s902_s12 = scalar_lea.vmem %s650_s11, 128  ;;  %p907_p3 = scmp.lt.s32.totalorder %s650_s11, %s650_s11 }
  0x3a   :  { %748 = vmatpush3.bf16.msra.mxu1 %v817_v19  ;;  %p903_p2 = scmp.ne.s32.totalorder %s650_s11, %s902_s12  ;;  %p908_p4 = scmp.lt.s32.totalorder %s902_s12, %s902_s12 }
  0x3b   :  { %749 = vmatprep.subr.bf16.mxu1 %v820_v22 }
  0x3c   :  { %728 = vmatpush3.bf16.msra.mxu0 %v819_v21  ;;  %p909_p5 = por %p908_p4, %p907_p3 }
  0x3d   :  { %729 = vmatprep.subr.bf16.mxu0 %v822_v24 }
  0x3e   :  { %750 = vmatpush3.bf16.msra.mxu1 %v821_v23  ;;  %p910_p6 = pnand %p909_p5, %p903_p2 }
  0x3f   :  { %751 = vmatprep.subr.bf16.mxu1 %v824_v26 }
  0x40   :  { %730 = vmatpush3.bf16.msra.mxu0 %v823_v25 }
  0x41   :  { %731 = vmatprep.subr.bf16.mxu0 %v826_v28 }
  0x42   :  { %752 = vmatpush3.bf16.msra.mxu1 %v825_v27 }
  0x43   :  { %753 = vmatprep.subr.bf16.mxu1 %v828_v30 }
  0x44   :  { %732 = vmatpush3.bf16.msra.mxu0 %v827_v29 }
  0x45   :  { %761 = vmatprep.subr.bf16.mxu0 %v832_v35 }
  0x46   :  { %754 = vmatpush3.bf16.msra.mxu1 %v831_v34 }
  0x47   :  { %506 = vmatmul.mubr.bf16.vlgmr.msra.gmra.mrb[0].mxu0 %v660_v32  ;;  %785 = vmatprep.subr.bf16.mxu1 %v934_v43 }
  0x48   :  { %762 = vmatpush3.bf16.msra.mxu0 %v835_v39  ;;  %585 = vmatprep.mubr.bf16.mxu0 %v665_v52 }
  0x49   :  { %546 = vmatmul.mubr.bf16.vlgmr.msra.gmra.mrb[0].mxu1 %v662_v37  ;;  %763 = vmatprep.subr.bf16.mxu0 %v836_v40 }
  0x4a   :  { %787 = vmatprep.mubr.msk.bf16.mxu1 %vm935_vm0, %v934_v43  ;;  %786 = vmatpush3.bf16.msra.mxu1 %v850_v50 }
  0x4c   :  { %764 = vmatpush3.bf16.msra.mxu0 %v837_v41 }
  0x4d   :  { %765 = vmatprep.subr.bf16.mxu0 %v838_v42 }
  0x50   :  { %766 = vmatpush3.bf16.msra.mxu0 %v839_v44 }
  0x51   :  { %767 = vmatprep.subr.bf16.mxu0 %v840_v45  ;;  %788 = vmatmul.mubr.msk.bf16.vlgmr.msra.gmra.mrb[4].mxu1 %vm469_vm1, %v853_v53 }
  0x54   :  { %768 = vmatpush3.bf16.msra.mxu0 %v841_v46 }
  0x55   :  { %769 = vmatprep.subr.bf16.mxu0 %v842_v47 }
  0x58   :  { %770 = vmatpush3.bf16.msra.mxu0 %v843_v48 }
  0x59   :  { %771 = vmatprep.subr.bf16.mxu0 %v844_v49 }
  0x5c   :  { %772 = vmatpush3.bf16.msra.mxu0 %v845_v54 }
  0x5d   :  { %773 = vmatprep.subr.bf16.mxu0 %v846_v55 }
  0x60   :  { %774 = vmatpush3.bf16.msra.mxu0 %v847_v56 }
  0x61   :  { %775 = vmatprep.subr.bf16.mxu0 %v848_v57 }
  0x64   :  { %776 = vmatpush3.bf16.msra.mxu0 %v849_v58 }
  0x67   :  { %586 = vmatmul.mubr.bf16.vlgmr.msra.gmra.mrb[4].mxu0 %v664_v59 }
 0x11a   :  { %v733_v60 = vpop.f32.mrb[0].mxu0 }
 0x11b   :  { %v734_v62 = vpop.f32.mrb[1].mxu0 }
 0x11c   :  { %v735_v63 = vadd.f32 %v734_v62, %v733_v60  ;;  %v736_v0 = vpop.f32.mrb[2].mxu0  ;;  %v755_v1 = vpop.f32.mrb[0].mxu1 }
 0x11d   :  { %v737_v2 = vpop.f32.mrb[3].mxu0  ;;  %v756_v3 = vpop.f32.mrb[1].mxu1 }
 0x11e   :  { %v508_v4 = vadd.f32 %v735_v63, %v659_v61  ;;  %v757_v5 = vadd.f32 %v756_v3, %v755_v1  ;;  %v758_v6 = vpop.f32.mrb[2].mxu1 }
 0x11f   :  { %v759_v7 = vpop.f32.mrb[3].mxu1 }
 0x120   :  { %v548_v8 = vadd.f32 %v757_v5, %v508_v4 }
 0x124   :  { %v627_v9 = vpop.f32.mrb[4].mxu1 }
 0x125   :  { %v789_v10 = vpop.f32.mrb[5].mxu1 }
 0x126   :  { %v630_v11 = vpop.f32.mrb[6].mxu1 }
 0x127   :  { %v790_v12 = vpop.f32.mrb[7].mxu1 }
 0x13a   :  { %v777_v13 = vpop.f32.mrb[4].mxu0 }
 0x13b   :  { %v778_v14 = vpop.f32.mrb[5].mxu0 }
 0x13c   :  { %v779_v15 = vadd.f32 %v778_v14, %v777_v13  ;;  %v780_v16 = vpop.f32.mrb[6].mxu0 }
 0x13d   :  { %v781_v17 = vpop.f32.mrb[7].mxu0 }
 0x13e   :  { %v588_v18 = vadd.f32 %v779_v15, %v548_v8 }
 0x140   :  { %v628_v19 = vadd.f32 %v627_v9, %v588_v18 }
 0x142   :  { %633 = vmax.xlane.f32.xlu0 %v628_v19 }
 0x1cf   :  { %v634_v20 = vpop.xlane.xlu0 %633 }
 0x1d0   :  { %v635_v21 = vsub.f32 %v628_v19, %v634_v20 }
 0x1d2   :  { %v636_v22 = vmul.f32 1.442695, %v635_v21 }
 0x1d4   :  { %854 = vpow2.f32 %v636_v22 }
 0x1de   :  { %v855_v23 = vpop.eup %854 }
 0x1df   :  { %638 = vadd.xlane.f32.xlu0 %v855_v23 }
 0x26c   :  { %v639_v24 = vpop.xlane.xlu0 %638 }
 0x26d   :  { %856 = vrcp.f32 %v639_v24 }
 0x277   :  { %v857_v25 = vpop.eup %856 }
 0x278   :  { %v641_v26 = vmul.f32 %v857_v25, %v855_v23 }
 0x27a   :  { %642 = vst [vmem:[#allocation7] sm:$0xff] %v641_v26 }
 0x27b   :  { %913 = shalt.err (!%p910_p6)
}
 0x27c   :  { %s914_s15 = scalar_lea.hbm %s1006_s3, 128 }
 0x27d   :  { %p915_p7 = scmp.ne.s32.totalorder %s1006_s3, %s914_s15  ;;  %p918_p8 = scmp.lt.u32.totalorder %s914_s15, %s1006_s3 }
 0x27f   :  { %p920_p9 = pnand %p918_p8, %p915_p7 }
 0x281   :  { %923 = shalt.err (!%p920_p9)
}
 0x282   :  { %652 = dma.vmem_to_hbm [thread:$0]  %s650_s11, 128, %s1006_s3, [#allocation4]  }
 0x283   :  { %928 = dma.done.wait [#allocation4], 128  }
 0x284   :  { %929 = vsyncadd [#allocation4], 4294967168 }
 0x285   :  { %656 = vsyncpa [#allocation3], 1 }
 0x286   :  { %657 = vsyncpa [#allocation6], 1 }
 0x287   :  { %658 = vsyncpa [#allocation4], 1 }

</bundles_post_ra>
